<compile_context>
chip_gen: v7x
topology: tpu7x:2x2x1
jax: 0.10.0
libtpu: 0.0.40
codegen_flags: <defaults>
</compile_context>

<pallas_src>
import functools

import jax
import jax.numpy as jnp
from jax.experimental import pallas as pl
from jax.experimental.pallas import tpu as pltpu


# ---------------------------------------------------------------------------
# Kernels
# ---------------------------------------------------------------------------

def _bn_whole_batch_kernel(x_ref, gamma_ref, beta_ref, rm_ref, rv_ref,
                           y_ref, new_rm_ref, new_rv_ref,
                           *, eps, momentum):
    """One feature tile, whole batch resident: local per-feature reduction."""
    x = x_ref[...].astype(jnp.float32)                        # (N, TF)
    inv_n = 1.0 / x.shape[0]

    mean = jnp.sum(x, axis=0, keepdims=True) * inv_n          # (1, TF)
    diff = x - mean
    var = jnp.sum(diff * diff, axis=0, keepdims=True) * inv_n  # unbiased=False

    inv_std = jax.lax.rsqrt(var + eps)
    gamma = gamma_ref[...].astype(jnp.float32)
    beta = beta_ref[...].astype(jnp.float32)

    # Fused affine: y = x * scale + shift
    scale = gamma * inv_std
    shift = beta - mean * scale
    y_ref[...] = (x * scale + shift).astype(y_ref.dtype)

    rm = rm_ref[...].astype(jnp.float32)
    rv = rv_ref[...].astype(jnp.float32)
    new_rm_ref[...] = (momentum * mean + (1.0 - momentum) * rm).astype(new_rm_ref.dtype)
    new_rv_ref[...] = (momentum * var + (1.0 - momentum) * rv).astype(new_rv_ref.dtype)


def _bn_stats_kernel(x_ref, gamma_ref, beta_ref, rm_ref, rv_ref,
                     scale_ref, shift_ref, new_rm_ref, new_rv_ref,
                     sum_ref, sumsq_ref,
                     *, eps, momentum, true_n):
    """Batch-tiled reduction: accumulate sum / sum-of-squares per feature tile.

    Padded batch rows are zeros (added in the wrapper) so they contribute
    nothing to either accumulator; we divide by the true batch size.
    """
    b = pl.program_id(1)

    @pl.when(b == 0)
    def _():
        sum_ref[...] = jnp.zeros_like(sum_ref)
        sumsq_ref[...] = jnp.zeros_like(sumsq_ref)

    x = x_ref[...].astype(jnp.float32)                        # (BN, TF)
    sum_ref[...] += jnp.sum(x, axis=0, keepdims=True)
    sumsq_ref[...] += jnp.sum(x * x, axis=0, keepdims=True)

    @pl.when(b == pl.num_programs(1) - 1)
    def _():
        inv_n = 1.0 / true_n
        mean = sum_ref[...] * inv_n
        var = sumsq_ref[...] * inv_n - mean * mean            # E[x^2] - mean^2
        var = jnp.maximum(var, 0.0)
        inv_std = jax.lax.rsqrt(var + eps)

        gamma = gamma_ref[...].astype(jnp.float32)
        beta = beta_ref[...].astype(jnp.float32)
        scale = gamma * inv_std
        shift = beta - mean * scale
        scale_ref[...] = scale.astype(scale_ref.dtype)
        shift_ref[...] = shift.astype(shift_ref.dtype)

        rm = rm_ref[...].astype(jnp.float32)
        rv = rv_ref[...].astype(jnp.float32)
        new_rm_ref[...] = (momentum * mean + (1.0 - momentum) * rm).astype(new_rm_ref.dtype)
        new_rv_ref[...] = (momentum * var + (1.0 - momentum) * rv).astype(new_rv_ref.dtype)


def _bn_apply_kernel(x_ref, scale_ref, shift_ref, y_ref):
    """Elementwise second pass: y = x * scale + shift."""
    x = x_ref[...].astype(jnp.float32)
    y_ref[...] = (x * scale_ref[...].astype(jnp.float32)
                  + shift_ref[...].astype(jnp.float32)).astype(y_ref.dtype)


# ---------------------------------------------------------------------------
# Tiling / VMEM heuristics
# ---------------------------------------------------------------------------

def _vmem_budget_bytes():
    """Generation-aware VMEM budget for the working set (tiles + temps)."""
    cap = 64 * 1024 * 1024
    try:
        info = pltpu.get_tpu_info()
        cap = int(getattr(info, "vmem_capacity_bytes", cap))
    except Exception:
        pass
    if cap >= 100 * 1024 * 1024:       # v5e / v6e: 128 MiB physical VMEM
        return 56 * 1024 * 1024
    return 40 * 1024 * 1024            # v7x: 64 MiB physical per TC


def _bytes_per_feature_col(n, itemsize):
    # double-buffered x in + y out (dtype) + two full-size f32 temporaries.
    return 4 * n * itemsize + 2 * n * 4


def _pick_feature_tile(n, f_padded, itemsize, budget):
    """Largest lane-dense TF that fits the budget; guarantee >= 2 tiles when
    the feature axis is wide enough (megacore sharding on v7x)."""
    bytes_per_col = _bytes_per_feature_col(n, itemsize)
    max_tf = (budget // bytes_per_col) // 128 * 128
    max_tf = max(128, int(max_tf))
    tf = min(f_padded, max_tf)
    if tf >= f_padded and f_padded >= 256:
        # Single-tile grid would idle one TC on v7x: split into 2 dense tiles.
        tf = ((f_padded // 2 + 127) // 128) * 128
    return int(tf)


# ---------------------------------------------------------------------------
# Wrapper
# ---------------------------------------------------------------------------

def batch_norm(x, gamma, beta, running_mean, running_var,
               eps=1e-5, momentum=0.1,
               feature_tile=None, batch_tile=None, force_two_pass=False):
    """Training-mode BatchNorm forward.

    x: (N, F). gamma/beta/running_*: (F,).
    Returns (x_norm, new_running_mean, new_running_var).
    """
    n, f = x.shape
    itemsize = jnp.dtype(x.dtype).itemsize

    # --- Pad the feature axis to a multiple of 128 (lane-dense stores). ---
    f_pad = max(128, ((f + 127) // 128) * 128)
    if f_pad != f:
        pad = f_pad - f
        x_p = jnp.pad(x, ((0, 0), (0, pad)))
        gamma_p = jnp.pad(gamma, (0, pad), constant_values=1.0)
        beta_p = jnp.pad(beta, (0, pad))
        rm_p = jnp.pad(running_mean, (0, pad))
        rv_p = jnp.pad(running_var, (0, pad), constant_values=1.0)
    else:
        x_p, gamma_p, beta_p, rm_p, rv_p = x, gamma, beta, running_mean, running_var

    gamma2 = gamma_p.reshape(1, f_pad)
    beta2 = beta_p.reshape(1, f_pad)
    rm2 = rm_p.reshape(1, f_pad)
    rv2 = rv_p.reshape(1, f_pad)

    budget = _vmem_budget_bytes()
    bytes_per_col = _bytes_per_feature_col(n, itemsize)
    single_pass_ok = (bytes_per_col * 128 <= budget) and not force_two_pass

    if single_pass_ok:
        # ---------------- Single pass: whole batch resident per tile -------
        tf = feature_tile if feature_tile is not None else _pick_feature_tile(
            n, f_pad, itemsize, budget)
        grid = (pl.cdiv(f_pad, tf),)

        footprint = bytes_per_col * tf + (2 << 20)
        vmem_limit = int(min(budget + (8 << 20), max(16 << 20, footprint)))

        kernel = functools.partial(_bn_whole_batch_kernel,
                                   eps=eps, momentum=momentum)
        x_spec = pl.BlockSpec((n, tf), lambda i: (0, i))
        v_spec = pl.BlockSpec((1, tf), lambda i: (0, i))

        y, new_rm, new_rv = pl.pallas_call(
            kernel,
            out_shape=(
                jax.ShapeDtypeStruct((n, f_pad), x.dtype),
                jax.ShapeDtypeStruct((1, f_pad), running_mean.dtype),
                jax.ShapeDtypeStruct((1, f_pad), running_var.dtype),
            ),
            grid_spec=pltpu.PrefetchScalarGridSpec(
                num_scalar_prefetch=0,
                grid=grid,
                in_specs=[x_spec, v_spec, v_spec, v_spec, v_spec],
                out_specs=[x_spec, v_spec, v_spec],
            ),
            compiler_params=pltpu.CompilerParams(
                dimension_semantics=("parallel",),
                vmem_limit_bytes=vmem_limit,
            ),
        )(x_p, gamma2, beta2, rm2, rv2)

    else:
        # ---------------- Two-pass: batch-tiled reduction (large N) --------
        tf = feature_tile if feature_tile is not None else min(f_pad, 1024)
        if batch_tile is not None:
            bn = batch_tile
        else:
            per_row = tf * max(itemsize, 4)
            bn = max(8, min(n, (budget // (6 * per_row)) // 8 * 8))
        n_pad = ((n + bn - 1) // bn) * bn
        if n_pad != n:
            x_p = jnp.pad(x_p, ((0, n_pad - n), (0, 0)))  # zero rows: no effect

        footprint = 6 * bn * tf * max(itemsize, 4) + (4 << 20)
        vmem_limit = int(min(budget + (8 << 20), max(16 << 20, footprint)))

        x_spec = pl.BlockSpec((bn, tf), lambda i, b: (b, i))
        v_spec = pl.BlockSpec((1, tf), lambda i, b: (0, i))
        grid = (pl.cdiv(f_pad, tf), pl.cdiv(n_pad, bn))

        stats_kernel = functools.partial(_bn_stats_kernel,
                                         eps=eps, momentum=momentum, true_n=n)
        scale, shift, new_rm, new_rv = pl.pallas_call(
            stats_kernel,
            out_shape=(
                jax.ShapeDtypeStruct((1, f_pad), jnp.float32),
                jax.ShapeDtypeStruct((1, f_pad), jnp.float32),
                jax.ShapeDtypeStruct((1, f_pad), running_mean.dtype),
                jax.ShapeDtypeStruct((1, f_pad), running_var.dtype),
            ),
            grid_spec=pltpu.PrefetchScalarGridSpec(
                num_scalar_prefetch=0,
                grid=grid,
                in_specs=[x_spec, v_spec, v_spec, v_spec, v_spec],
                out_specs=[v_spec, v_spec, v_spec, v_spec],
                scratch_shapes=[pltpu.VMEM((1, tf), jnp.float32),
                                pltpu.VMEM((1, tf), jnp.float32)],
            ),
            compiler_params=pltpu.CompilerParams(
                dimension_semantics=("parallel", "arbitrary"),
                vmem_limit_bytes=vmem_limit,
            ),
        )(x_p, gamma2, beta2, rm2, rv2)

        y = pl.pallas_call(
            _bn_apply_kernel,
            out_shape=jax.ShapeDtypeStruct((n_pad, f_pad), x.dtype),
            grid_spec=pltpu.PrefetchScalarGridSpec(
                num_scalar_prefetch=0,
                grid=grid,
                in_specs=[x_spec, v_spec, v_spec],
                out_specs=x_spec,
            ),
            compiler_params=pltpu.CompilerParams(
                dimension_semantics=("parallel", "parallel"),
                vmem_limit_bytes=vmem_limit,
            ),
        )(x_p, scale, shift)
        y = y[:n]

    # Strip the feature padding.
    if f_pad != f:
        y = y[:, :f]
    new_rm = new_rm.reshape(-1)[:f]
    new_rv = new_rv.reshape(-1)[:f]
    return y, new_rm, new_rv


# ---------------------------------------------------------------------------
# Reference & tests
# ---------------------------------------------------------------------------

def _reference(x, gamma, beta, running_mean, running_var, eps=1e-5, momentum=0.1):
    mean = jnp.mean(x, axis=0)
    var = jnp.mean((x - mean) ** 2, axis=0)   # unbiased=False, matches module
    x_norm = (x - mean) / jnp.sqrt(var + eps)
    y = gamma * x_norm + beta
    new_rm = momentum * mean + (1 - momentum) * running_mean
    new_rv = momentum * var + (1 - momentum) * running_var
    return y, new_rm, new_rv


def _run_case(key, batch, num_features, **kwargs):
    x = jax.random.normal(key, (batch, num_features), dtype=jnp.float32)
    gamma = jnp.ones((num_features,), dtype=jnp.float32)
    beta = jnp.zeros((num_features,), dtype=jnp.float32)
    running_mean = jnp.zeros((num_features,), dtype=jnp.float32)
    running_var = jnp.ones((num_features,), dtype=jnp.float32)

    y, new_rm, new_rv = batch_norm(x, gamma, beta, running_mean, running_var,
                                   **kwargs)
    jax.block_until_ready((y, new_rm, new_rv))

    y_ref, rm_ref, rv_ref = _reference(x, gamma, beta, running_mean, running_var)
    assert jnp.allclose(y, y_ref, atol=1e-5, rtol=1e-5)
    assert jnp.allclose(new_rm, rm_ref, atol=1e-5, rtol=1e-5)
    assert jnp.allclose(new_rv, rv_ref, atol=1e-5, rtol=1e-5)


if __name__ == "__main__":
    key = jax.random.PRNGKey(0)
    k1, k2, k3, k4 = jax.random.split(key, 4)

    # Primary small case implied by the module (hidden feature vector).
    # F=32 is padded to 128 so stores stay lane-dense.
    _run_case(k1, batch=8, num_features=32)

    # Multi-tile feature path with an explicit tile (ragged F vs TF exercised).
    _run_case(k2, batch=16, num_features=384, feature_tile=128)

    # Auto tiling: F fits in one tile -> forced 2-tile split (megacore path).
    _run_case(k3, batch=8, num_features=384)

    # Large-batch fallback: batch-tiled two-pass reduction path.
    _run_case(k4, batch=64, num_features=256, force_two_pass=True, batch_tile=16)

    print("KERNEL_OK")
</pallas_src>

<mosaic_0001>
module attributes {stable_mosaic.version = 11 : i64} {
  func.func @_bn_whole_batch_kernel(%arg0: i32, %arg1: memref<8x128xf32, #tpu.memory_space<vmem>>, %arg2: memref<1x128xf32, #tpu.memory_space<vmem>>, %arg3: memref<1x128xf32, #tpu.memory_space<vmem>>, %arg4: memref<1x128xf32, #tpu.memory_space<vmem>>, %arg5: memref<1x128xf32, #tpu.memory_space<vmem>>, %arg6: memref<8x128xf32, #tpu.memory_space<vmem>>, %arg7: memref<1x128xf32, #tpu.memory_space<vmem>>, %arg8: memref<1x128xf32, #tpu.memory_space<vmem>>) attributes {dimension_semantics = [#tpu.dimension_semantics<parallel>], iteration_bounds = array<i64: 1>, scalar_prefetch = 0 : i64, scratch_operands = 0 : i64, tpu.core_type = #tpu.core_type<tc>, window_params = [{transform_indices = @transform_0, window_bounds = array<i64: 8, 128>}, {transform_indices = @transform_1, window_bounds = array<i64: 1, 128>}, {transform_indices = @transform_2, window_bounds = array<i64: 1, 128>}, {transform_indices = @transform_3, window_bounds = array<i64: 1, 128>}, {transform_indices = @transform_4, window_bounds = array<i64: 1, 128>}, {transform_indices = @transform_5, window_bounds = array<i64: 8, 128>}, {transform_indices = @transform_6, window_bounds = array<i64: 1, 128>}, {transform_indices = @transform_7, window_bounds = array<i64: 1, 128>}]} {
    %c0 = arith.constant 0 : index
    %c0_0 = arith.constant 0 : index
    %0 = vector.load %arg1[%c0, %c0_0] : memref<8x128xf32, #tpu.memory_space<vmem>>, vector<8x128xf32>
    %cst = arith.constant dense<0.000000e+00> : vector<128xf32>
    %1 = vector.multi_reduction <add>, %0, %cst [0] : vector<8x128xf32> to vector<128xf32>
    %2 = vector.shape_cast %1 : vector<128xf32> to vector<1x128xf32>
    %cst_1 = arith.constant 1.250000e-01 : f32
    %3 = vector.broadcast %cst_1 : f32 to vector<1x128xf32>
    %4 = arith.mulf %2, %3 : vector<1x128xf32>
    %5 = vector.broadcast %4 : vector<1x128xf32> to vector<8x128xf32>
    %6 = arith.subf %0, %5 : vector<8x128xf32>
    %7 = arith.mulf %6, %6 : vector<8x128xf32>
    %cst_2 = arith.constant dense<0.000000e+00> : vector<128xf32>
    %8 = vector.multi_reduction <add>, %7, %cst_2 [0] : vector<8x128xf32> to vector<128xf32>
    %9 = vector.shape_cast %8 : vector<128xf32> to vector<1x128xf32>
    %cst_3 = arith.constant 1.250000e-01 : f32
    %10 = vector.broadcast %cst_3 : f32 to vector<1x128xf32>
    %11 = arith.mulf %9, %10 : vector<1x128xf32>
    %cst_4 = arith.constant 9.99999974E-6 : f32
    %12 = vector.broadcast %cst_4 : f32 to vector<1x128xf32>
    %13 = arith.addf %11, %12 : vector<1x128xf32>
    %14 = math.rsqrt %13 : vector<1x128xf32>
    %c0_5 = arith.constant 0 : index
    %c0_6 = arith.constant 0 : index
    %15 = vector.load %arg2[%c0_5, %c0_6] : memref<1x128xf32, #tpu.memory_space<vmem>>, vector<1x128xf32>
    %c0_7 = arith.constant 0 : index
    %c0_8 = arith.constant 0 : index
    %16 = vector.load %arg3[%c0_7, %c0_8] : memref<1x128xf32, #tpu.memory_space<vmem>>, vector<1x128xf32>
    %17 = arith.mulf %15, %14 : vector<1x128xf32>
    %18 = arith.mulf %4, %17 : vector<1x128xf32>
    %19 = arith.subf %16, %18 : vector<1x128xf32>
    %20 = vector.broadcast %17 : vector<1x128xf32> to vector<8x128xf32>
    %21 = arith.mulf %0, %20 : vector<8x128xf32>
    %22 = vector.broadcast %19 : vector<1x128xf32> to vector<8x128xf32>
    %23 = arith.addf %21, %22 : vector<8x128xf32>
    %c0_9 = arith.constant 0 : index
    %c0_10 = arith.constant 0 : index
    %24 = vector.load %arg6[%c0_9, %c0_10] : memref<8x128xf32, #tpu.memory_space<vmem>>, vector<8x128xf32>
    tpu.vector_store %arg6[%c0_9, %c0_10], %23 {strides = array<i32>} : memref<8x128xf32, #tpu.memory_space<vmem>>, vector<8x128xf32>,
    %c0_11 = arith.constant 0 : index
    %c0_12 = arith.constant 0 : index
    %25 = vector.load %arg4[%c0_11, %c0_12] : memref<1x128xf32, #tpu.memory_space<vmem>>, vector<1x128xf32>
    %c0_13 = arith.constant 0 : index
    %c0_14 = arith.constant 0 : index
    %26 = vector.load %arg5[%c0_13, %c0_14] : memref<1x128xf32, #tpu.memory_space<vmem>>, vector<1x128xf32>
    %cst_15 = arith.constant 1.000000e-01 : f32
    %27 = vector.broadcast %cst_15 : f32 to vector<1x128xf32>
    %28 = arith.mulf %27, %4 : vector<1x128xf32>
    %cst_16 = arith.constant 0.899999976 : f32
    %29 = vector.broadcast %cst_16 : f32 to vector<1x128xf32>
    %30 = arith.mulf %29, %25 : vector<1x128xf32>
    %31 = arith.addf %28, %30 : vector<1x128xf32>
    %c0_17 = arith.constant 0 : index
    %c0_18 = arith.constant 0 : index
    %32 = vector.load %arg7[%c0_17, %c0_18] : memref<1x128xf32, #tpu.memory_space<vmem>>, vector<1x128xf32>
    tpu.vector_store %arg7[%c0_17, %c0_18], %31 {strides = array<i32>} : memref<1x128xf32, #tpu.memory_space<vmem>>, vector<1x128xf32>,
    %cst_19 = arith.constant 1.000000e-01 : f32
    %33 = vector.broadcast %cst_19 : f32 to vector<1x128xf32>
    %34 = arith.mulf %33, %11 : vector<1x128xf32>
    %cst_20 = arith.constant 0.899999976 : f32
    %35 = vector.broadcast %cst_20 : f32 to vector<1x128xf32>
    %36 = arith.mulf %35, %26 : vector<1x128xf32>
    %37 = arith.addf %34, %36 : vector<1x128xf32>
    %c0_21 = arith.constant 0 : index
    %c0_22 = arith.constant 0 : index
    %38 = vector.load %arg8[%c0_21, %c0_22] : memref<1x128xf32, #tpu.memory_space<vmem>>, vector<1x128xf32>
    tpu.vector_store %arg8[%c0_21, %c0_22], %37 {strides = array<i32>} : memref<1x128xf32, #tpu.memory_space<vmem>>, vector<1x128xf32>,
    return
  }
  func.func @transform_0(%arg0: i32) -> (i32, i32) {
    %c0_i32 = arith.constant 0 : i32
    %c0_i32_0 = arith.constant 0 : i32
    return %c0_i32, %arg0 : i32, i32
  }
  func.func @transform_1(%arg0: i32) -> (i32, i32) {
    %c0_i32 = arith.constant 0 : i32
    %c0_i32_0 = arith.constant 0 : i32
    return %c0_i32, %arg0 : i32, i32
  }
  func.func @transform_2(%arg0: i32) -> (i32, i32) {
    %c0_i32 = arith.constant 0 : i32
    %c0_i32_0 = arith.constant 0 : i32
    return %c0_i32, %arg0 : i32, i32
  }
  func.func @transform_3(%arg0: i32) -> (i32, i32) {
    %c0_i32 = arith.constant 0 : i32
    %c0_i32_0 = arith.constant 0 : i32
    return %c0_i32, %arg0 : i32, i32
  }
  func.func @transform_4(%arg0: i32) -> (i32, i32) {
    %c0_i32 = arith.constant 0 : i32
    %c0_i32_0 = arith.constant 0 : i32
    return %c0_i32, %arg0 : i32, i32
  }
  func.func @transform_5(%arg0: i32) -> (i32, i32) {
    %c0_i32 = arith.constant 0 : i32
    %c0_i32_0 = arith.constant 0 : i32
    return %c0_i32, %arg0 : i32, i32
  }
  func.func @transform_6(%arg0: i32) -> (i32, i32) {
    %c0_i32 = arith.constant 0 : i32
    %c0_i32_0 = arith.constant 0 : i32
    return %c0_i32, %arg0 : i32, i32
  }
  func.func @transform_7(%arg0: i32) -> (i32, i32) {
    %c0_i32 = arith.constant 0 : i32
    %c0_i32_0 = arith.constant 0 : i32
    return %c0_i32, %arg0 : i32, i32
  }
}

</mosaic_0001>

<bundles_post_ra>
// kernel: tpu_custom_call.1
= control target key start
LH: loop header
LB: loop body
LE: loop exit
PB: predicated region body
PF: predicated region fallthrough
CT: control target
= control target key end

     0   :  { %13 = vsyncpa [#allocation3], 0  ;;  %s338_s0 = inlined_call_operand.hbm [shape: f32[8,128], index: 0, kind: input, shape index: {}]   ;;  %s339_s1 = inlined_call_operand.vmem [shape: f32[1,128], index: 1, kind: input, shape index: {}]   ;;  %s340_s2 = inlined_call_operand.vmem [shape: f32[1,128], index: 2, kind: input, shape index: {}]   ;;  %s341_s3 = inlined_call_operand.vmem [shape: f32[1,128], index: 3, kind: input, shape index: {}]   ;;  %s342_s4 = inlined_call_operand.vmem [shape: f32[1,128], index: 4, kind: input, shape index: {}]   ;;  %s343_s5 = inlined_call_operand.hbm [shape: f32[8,128], index: 5, kind: output, shape index: {0}]   ;;  %s344_s6 = inlined_call_operand.hbm [shape: f32[1,128], index: 6, kind: output, shape index: {1}]   ;;  %s345_s7 = inlined_call_operand.hbm [shape: f32[1,128], index: 7, kind: output, shape index: {2}]  }
   0x1   :  { %14 = vsyncpa [#allocation4], 0 }
   0x2   :  { %15 = vsyncpa [#allocation7], 0  ;;  %s228_s24 = smov [#allocation2]   ;;  %s134_s28 = scalar_lea.hbm %s338_s0, 128 }
   0x3   :  { %s22_s25 = sshll.u32 %s228_s24, 4  ;;  %p135_p0 = scmp.ne.s32.totalorder %s338_s0, %s134_s28  ;;  %s23_s25 = int_to_ptr.vmem [resolvable:$true] %s22_s25 }
   0x4   :  { %p138_p1 = scmp.lt.u32.totalorder %s134_s28, %s338_s0 }
   0x6   :  { %p140_p2 = pnand %p138_p1, %p135_p0 }
   0x8   :  { %143 = shalt.err (!%p140_p2)
}
   0x9   :  { %s144_s10 = scalar_lea.vmem %s23_s25, 128  ;;  %p149_p4 = scmp.lt.s32.totalorder %s23_s25, %s23_s25 }
   0xa   :  { %p145_p3 = scmp.ne.s32.totalorder %s23_s25, %s144_s10  ;;  %p150_p5 = scmp.lt.s32.totalorder %s144_s10, %s144_s10 }
   0xc   :  { %p151_p6 = por %p150_p5, %p149_p4 }
   0xe   :  { %p152_p7 = pnand %p151_p6, %p145_p3 }
  0x10   :  { %155 = shalt.err (!%p152_p7)
}
  0x11   :  { %25 = dma.hbm_to_vmem [thread:$0]  %s338_s0, 128, %s23_s25, [#allocation3]  }
  0x12   :  { %222 = dma.done.wait [#allocation3], 128  }
  0x13   :  { %223 = vsyncadd [#allocation3], 4294967168  ;;  %v284_v0 = vld [vmem:[#allocation2] sm:$0xff]  ;;  %s229_s15 = smov [#allocation6]  }
  0x14   :  { %v38_v1 = vrot.slane %v284_v0, 4  ;;  %v76_v6 = vld [vmem:[%s341_s3] sm:$0x1]  ;;  %s102_s0 = sshll.u32 %s229_s15, 4  ;;  %s103_s0 = int_to_ptr.vmem [resolvable:$true] %s102_s0 }
  0x15   :  { %v79_v9 = vmul.f32 0.9, %v76_v6  ;;  %s156_s16 = scalar_lea.vmem %s103_s0, 16  ;;  %s160_s17 = scalar_lea.vmem %s103_s0, 32 }
  0x16   :  { %v39_v2 = vadd.f32 %v38_v1, %v284_v0  ;;  %p157_p8 = scmp.ne.s32.totalorder %s103_s0, %s156_s16  ;;  %p161_p9 = scmp.lt.s32.totalorder %s103_s0, %s103_s0 }
  0x17   :  { %p162_p10 = scmp.lt.s32.totalorder %s160_s17, %s156_s16 }
  0x18   :  { %v40_v3 = vrot.slane %v39_v2, 2 }
  0x19   :  { %p163_p11 = por %p162_p10, %p161_p9 }
  0x1a   :  { %v41_v4 = vadd.f32 %v40_v3, %v39_v2 }
  0x1b   :  { %p164_p12 = pnand %p163_p11, %p157_p8 }
  0x1c   :  { %v42_v5 = vrot.slane %v41_v4, 1 }
  0x1e   :  { %v43_v7 = vadd.f32 %v42_v5, %v41_v4 }
  0x20   :  { %v44_v8 = vmul.f32 0.125, %v43_v7 }
  0x22   :  { %v45_v10 = vsub.f32 %v284_v0, %v44_v8  ;;  %v78_v11 = vmul.f32 0.1, %v44_v8 }
  0x24   :  { %v46_v12 = vmul.f32 %v45_v10, %v45_v10  ;;  %v80_v13 = vadd.f32 %v79_v9, %v78_v11 }
  0x26   :  { %v47_v14 = vrot.slane %v46_v12, 4  ;;  %81 = vst [vmem:[#allocation6] sm:$0x1] %v80_v13 }
  0x27   :  { %167 = shalt.err (!%p164_p12)
}
  0x28   :  { %s168_s19 = scalar_lea.hbm %s344_s6, 16 }
  0x29   :  { %p169_p13 = scmp.ne.s32.totalorder %s344_s6, %s168_s19  ;;  %p172_p0 = scmp.lt.u32.totalorder %s168_s19, %s344_s6 }
  0x2b   :  { %p174_p1 = pnand %p172_p0, %p169_p13 }
  0x2d   :  { %177 = shalt.err (!%p174_p1)
}
  0x2e   :  { %105 = dma.vmem_to_hbm [thread:$0]  %s103_s0, 16, %s344_s6, [#allocation7]   ;;  %v48_v15 = vadd.f32 %v47_v14, %v46_v12  ;;  %v77_v19 = vld [vmem:[%s342_s4] sm:$0x1]  ;;  %v62_v26 = vlaneseq }
  0x2f   :  { %v83_v22 = vmul.f32 0.9, %v77_v19  ;;  %s230_s28 = smov [#allocation8]  }
  0x30   :  { %v49_v16 = vrot.slane %v48_v15, 2  ;;  %s112_s29 = sshll.u32 %s230_s28, 4  ;;  %s113_s29 = int_to_ptr.vmem [resolvable:$true] %s112_s29 }
  0x31   :  { %s178_s6 = scalar_lea.vmem %s113_s29, 16  ;;  %s182_s30 = scalar_lea.vmem %s113_s29, 32 }
  0x32   :  { %v50_v17 = vadd.f32 %v49_v16, %v48_v15  ;;  %p179_p2 = scmp.ne.s32.totalorder %s113_s29, %s178_s6  ;;  %p183_p3 = scmp.lt.s32.totalorder %s113_s29, %s113_s29 }
  0x33   :  { %p184_p4 = scmp.lt.s32.totalorder %s182_s30, %s178_s6 }
  0x34   :  { %v51_v18 = vrot.slane %v50_v17, 1 }
  0x35   :  { %p185_p5 = por %p184_p4, %p183_p3 }
  0x36   :  { %v52_v20 = vadd.f32 %v51_v18, %v50_v17 }
  0x37   :  { %p186_p6 = pnand %p185_p5, %p179_p2 }
  0x38   :  { %v53_v21 = vmul.f32 0.125, %v52_v20 }
  0x3a   :  { %v54_v23 = vadd.f32 1e-05, %v53_v21  ;;  %v82_v24 = vmul.f32 0.1, %v53_v21 }
  0x3c   :  { %132 = vrsqrt.f32 %v54_v23  ;;  %v84_v25 = vadd.f32 %v83_v22, %v82_v24 }
  0x3e   :  { %85 = vst [vmem:[#allocation8] sm:$0x1] %v84_v25 }
  0x3f   :  { %189 = shalt.err (!%p186_p6)
}
  0x40   :  { %s190_s9 = scalar_lea.hbm %s345_s7, 16 }
  0x41   :  { %p191_p7 = scmp.ne.s32.totalorder %s345_s7, %s190_s9  ;;  %p194_p8 = scmp.lt.u32.totalorder %s190_s9, %s345_s7 }
  0x43   :  { %p196_p9 = pnand %p194_p8, %p191_p7 }
  0x45   :  { %199 = shalt.err (!%p196_p9)
}
  0x46   :  { %115 = dma.vmem_to_hbm [thread:$0]  %s113_s29, 16, %s345_s7, [#allocation7]   ;;  %v63_v27 = vshrl.u32 %v62_v26, 7  ;;  %v56_v28 = vld [vmem:[%s339_s1] sm:$0x1]  ;;  %v133_v30 = vpop.eup %132 }
  0x47   :  { %v58_v31 = vmul.f32 %v133_v30, %v56_v28  ;;  %v57_v32 = vld [vmem:[%s340_s2] sm:$0x1]  ;;  %s231_s18 = smov [#allocation5]  }
  0x48   :  { %v64_v29 = vsub.s32 0, %v63_v27  ;;  %s92_s19 = sshll.u32 %s231_s18, 4  ;;  %s93_s19 = int_to_ptr.vmem [resolvable:$true] %s92_s19 }
  0x49   :  { %v59_v33 = vmul.f32 %v58_v31, %v44_v8  ;;  %s200_s7 = scalar_lea.vmem %s93_s19, 128  ;;  %p205_p11 = scmp.lt.s32.totalorder %s93_s19, %s93_s19 }
  0x4a   :  { %v65_v34 = vrot.slane %v58_v31, %v64_v29  ;;  %p201_p10 = scmp.ne.s32.totalorder %s93_s19, %s200_s7  ;;  %p206_p12 = scmp.lt.s32.totalorder %s200_s7, %s200_s7 }
  0x4b   :  { %v60_v35 = vsub.f32 %v57_v32, %v59_v33 }
  0x4c   :  { %v67_v36 = vmul.f32 %v65_v34, %v284_v0  ;;  %p207_p13 = por %p206_p12, %p205_p11 }
  0x4d   :  { %v72_v37 = vrot.slane %v60_v35, %v64_v29 }
  0x4e   :  { %p208_p0 = pnand %p207_p13, %p201_p10 }
  0x4f   :  { %v74_v38 = vadd.f32 %v72_v37, %v67_v36 }
  0x51   :  { %75 = vst [vmem:[#allocation5] sm:$0xff] %v74_v38 }
  0x52   :  { %211 = shalt.err (!%p208_p0)
}
  0x53   :  { %s212_s20 = scalar_lea.hbm %s343_s5, 128 }
  0x54   :  { %p213_p1 = scmp.ne.s32.totalorder %s343_s5, %s212_s20  ;;  %p216_p2 = scmp.lt.u32.totalorder %s212_s20, %s343_s5 }
  0x56   :  { %p218_p3 = pnand %p216_p2, %p213_p1 }
  0x58   :  { %221 = shalt.err (!%p218_p3)
}
  0x59   :  { %95 = dma.vmem_to_hbm [thread:$0]  %s93_s19, 128, %s343_s5, [#allocation4]  }
  0x5a   :  { %224 = dma.done.wait [#allocation4], 128  }
  0x5b   :  { %225 = vsyncadd [#allocation4], 4294967168 }
  0x5c   :  { %226 = dma.done.wait [#allocation7], 32  }
  0x5d   :  { %227 = vsyncadd [#allocation7], 4294967264 }
  0x5e   :  { %125 = vsyncpa [#allocation3], 1 }
  0x5f   :  { %126 = vsyncpa [#allocation4], 1 }
  0x60   :  { %127 = vsyncpa [#allocation7], 1 }

</bundles_post_ra>
